<compile_context>
chip_gen: v5e
topology: v5e:2x2
jax: 0.10.0
libtpu: 0.0.40
codegen_flags: <defaults>
</compile_context>

<pallas_src>
import jax
import jax.numpy as jnp
from jax.experimental import pallas as pl
from jax.experimental.pallas import tpu as pltpu

KSIZE = 7   # spatial-attention Conv1d kernel size
PAD = 3     # padding = 3  (same-length conv)


def cbam_kernel(x_ref, w1_ref, w2t_ref, wsp_ref, bsp_ref, o_ref):
    # x_ref:   (BB, C, L) VMEM block
    # w1_ref:  (Cr, C) VMEM  -- fc1 weight (PyTorch layout, kernel dim squeezed)
    # w2t_ref: (Cr, C) VMEM  -- fc2 weight, transposed
    # wsp_ref: (2*KSIZE,) SMEM -- spatial conv weight, row-major [avg taps ; max taps]
    # bsp_ref: (1,) SMEM       -- spatial conv bias
    x = x_ref[...]
    BB, C, L = x.shape
    in_dtype = x.dtype
    Cr = w1_ref.shape[0]

    # ---------------- Channel attention ----------------
    # Mean over L with f32 accumulation (no full-slab f32 temp); max is exact
    # in the input dtype, only the tiny (BB, C) result is cast.
    avg = jnp.sum(x, axis=2, dtype=jnp.float32) * (1.0 / L)       # (BB, C)
    mx = jnp.max(x, axis=2).astype(jnp.float32)                   # (BB, C)
    pooled = jnp.concatenate([avg, mx], axis=0)                   # (2*BB, C)

    if Cr < 8:
        # MXU-degenerate bottleneck: unrolled VPU broadcast-FMA over Cr.
        w1 = w1_ref[...].astype(jnp.float32)        # (Cr, C)
        w2t = w2t_ref[...].astype(jnp.float32)      # (Cr, C)
        mlp = jnp.zeros((2 * BB, C), jnp.float32)
        for r in range(Cr):
            h_r = jnp.maximum(
                jnp.sum(pooled * w1[r:r + 1, :], axis=-1, keepdims=True), 0.0)  # (2*BB, 1)
            mlp = mlp + h_r * w2t[r:r + 1, :]                                   # (2*BB, C)
    else:
        # MXU path: bf16 operands, f32 accumulation (full-rate MXU on v5e/v6e/v7x).
        pooled_m = pooled.astype(jnp.bfloat16)
        w1 = w1_ref[...].astype(jnp.bfloat16)       # (Cr, C)
        w2t = w2t_ref[...].astype(jnp.bfloat16)     # (Cr, C)
        h = jnp.maximum(
            jax.lax.dot_general(pooled_m, w1, (((1,), (1,)), ((), ())),
                                preferred_element_type=jnp.float32), 0.0)       # (2*BB, Cr)
        mlp = jnp.dot(h.astype(jnp.bfloat16), w2t,
                      preferred_element_type=jnp.float32)                       # (2*BB, C)

    ca = jax.nn.sigmoid(mlp[:BB] + mlp[BB:])          # (BB, C) f32
    y = ca.astype(in_dtype)[:, :, None] * x           # (BB, C, L) channel-gated

    # ---------------- Spatial attention ----------------
    # Conv1d(in=2, out=1, k=7, pad=3) over [mean_over_C ; max_over_C]
    avg_c = jnp.sum(y, axis=1, dtype=jnp.float32) * (1.0 / C)     # (BB, L)
    max_c = jnp.max(y, axis=1).astype(jnp.float32)                # (BB, L)
    st = jnp.concatenate([avg_c, max_c], axis=0)                  # (2*BB, L)

    # Hoisted out of the tap loop: lane iota (for the edge masks), row mask
    # (avg rows vs max rows) and the bias scalar.
    lane = jax.lax.broadcasted_iota(jnp.int32, st.shape, 1)       # (2*BB, L)
    row = jax.lax.broadcasted_iota(jnp.int32, (2 * BB, 1), 0)
    is_avg = row < BB                                             # (2*BB, 1)
    bias = bsp_ref[0]

    acc = jnp.zeros(st.shape, jnp.float32)                        # (2*BB, L)
    for k in range(KSIZE):
        s = k - PAD                                   # static shift in [-3, 3]
        if s == 0:
            shifted = st
        else:
            # shifted[:, l] = st[:, l + s], zero outside [0, L)
            rolled = pltpu.roll(st, shift=(-s) % L, axis=1)
            mask = (lane + s >= 0) & (lane + s < L)
            shifted = jnp.where(mask, rolled, 0.0)
        # Per-tap weight column: avg-channel weight on the first BB rows,
        # max-channel weight on the last BB rows -> one FMA per tap.
        wk = jnp.where(is_avg, wsp_ref[k], wsp_ref[KSIZE + k])    # (2*BB, 1)
        acc = acc + wk * shifted
    conv = acc[:BB] + acc[BB:] + bias                             # (BB, L)
    sa = jax.nn.sigmoid(conv)

    o_ref[...] = (sa.astype(in_dtype)[:, None, :] * y).astype(o_ref.dtype)


def _pick_block_b(B, C, L, itemsize, vmem_cap_bytes):
    """Pick the batch block from a VMEM budget.

    Budget the (BB, C, L) slab so roughly 2 input + 2 output pipeline buffers
    plus in-kernel temporaries stay well inside VMEM (64 MiB/TC on v7x,
    128 MiB on v5e/v6e). Prefer >=2 grid steps (megacore on v7x) and a
    sublane-aligned BB, then the largest slab that fits (amortizes the
    ~0.35 us/step grid overhead).
    """
    per_batch = C * L * itemsize
    max_slab = max(vmem_cap_bytes // 8, per_batch)   # never below one batch
    sublane = 8 if itemsize >= 4 else (16 if itemsize == 2 else 32)

    divisors = [d for d in range(1, B + 1) if B % d == 0]
    fits = [d for d in divisors if d * per_batch <= max_slab]
    if not fits:
        # Even a single batch overshoots the budget.
        # TODO(synk): add an L grid axis with a PAD halo instead.
        return 1
    return max(fits, key=lambda d: ((B // d >= 2), (d % sublane == 0), d))


def cbam(x, w1, w2, wsp, bsp, *, block_b=None, vmem_cap_bytes=None):
    B, C, L = x.shape
    Cr = w1.shape[0]
    itemsize = jnp.dtype(x.dtype).itemsize

    if vmem_cap_bytes is None:
        try:
            vmem_cap_bytes = int(pltpu.get_tpu_info().vmem_capacity_bytes)
        except Exception:
            vmem_cap_bytes = 64 << 20   # conservative: v7x per-TensorCore VMEM

    if block_b is None:
        block_b = _pick_block_b(B, C, L, itemsize, vmem_cap_bytes)
    assert B % block_b == 0, "batch must divide evenly into block_b"

    w2t = jnp.transpose(w2)             # (Cr, C)
    wsp_flat = jnp.reshape(wsp, (-1,))  # (2*KSIZE,) row-major: [w[0,:], w[1,:]]

    vmem_limit = int(vmem_cap_bytes * 0.8)

    return pl.pallas_call(
        cbam_kernel,
        out_shape=jax.ShapeDtypeStruct((B, C, L), x.dtype),
        grid_spec=pltpu.PrefetchScalarGridSpec(
            num_scalar_prefetch=0,
            grid=(B // block_b,),
            in_specs=[
                pl.BlockSpec((block_b, C, L), lambda b: (b, 0, 0)),    # x slab
                pl.BlockSpec((Cr, C), lambda b: (0, 0)),               # fc1 weight (resident)
                pl.BlockSpec((Cr, C), lambda b: (0, 0)),               # fc2 weight.T (resident)
                pl.BlockSpec(memory_space=pltpu.MemorySpace.SMEM),     # flat conv weights (14,)
                pl.BlockSpec(memory_space=pltpu.MemorySpace.SMEM),     # conv bias (1,)
            ],
            out_specs=pl.BlockSpec((block_b, C, L), lambda b: (b, 0, 0)),
        ),
        compiler_params=pltpu.CompilerParams(
            dimension_semantics=("parallel",),     # batch blocks independent -> megacore on v7x
            vmem_limit_bytes=vmem_limit,
        ),
    )(x, w1, w2t, wsp_flat, bsp)


def cbam_ref(x, w1, w2, wsp, bsp):
    """Pure-JAX reference matching the PyTorch forward."""
    avg = jnp.mean(x, axis=2, keepdims=True)      # (B, C, 1)
    mx = jnp.max(x, axis=2, keepdims=True)

    def mlp(v):
        h = jnp.maximum(jnp.einsum('rc,bcl->brl', w1, v), 0.0)
        return jnp.einsum('cr,brl->bcl', w2, h)

    ca = jax.nn.sigmoid(mlp(avg) + mlp(mx))       # (B, C, 1)
    y = ca * x
    avg_c = jnp.mean(y, axis=1, keepdims=True)    # (B, 1, L)
    max_c = jnp.max(y, axis=1, keepdims=True)
    st = jnp.concatenate([avg_c, max_c], axis=1)  # (B, 2, L)
    pad = jnp.pad(st, ((0, 0), (0, 0), (PAD, PAD)))
    B, _, L = x.shape
    conv = jnp.zeros((B, 1, L), jnp.float32) + bsp[0]
    for k in range(KSIZE):
        conv = conv + wsp[0, k] * pad[:, 0:1, k:k + L] + wsp[1, k] * pad[:, 1:2, k:k + L]
    sa = jax.nn.sigmoid(conv)
    return sa * y


if __name__ == "__main__":
    B, C, L = 4, 32, 128            # channel // 16 must be >= 1 (PyTorch hardcodes //16)
    Cr = C // 16

    key = jax.random.PRNGKey(0)
    k1, k2, k3, k4, kx = jax.random.split(key, 5)
    w1 = jax.random.normal(k1, (Cr, C), jnp.float32) * 0.2     # Conv1d(C, C//16, 1, bias=False).weight[:, :, 0]
    w2 = jax.random.normal(k2, (C, Cr), jnp.float32) * 0.2     # Conv1d(C//16, C, 1, bias=False).weight[:, :, 0]
    wsp = jax.random.normal(k3, (2, KSIZE), jnp.float32) * 0.2  # Conv1d(2, 1, 7).weight[0]
    bsp = jax.random.normal(k4, (1,), jnp.float32) * 0.1        # Conv1d(2, 1, 7).bias
    x = jax.random.normal(kx, (B, C, L), jnp.float32)

    out = cbam(x, w1, w2, wsp, bsp)
    jax.block_until_ready(out)

    ref = cbam_ref(x, w1, w2, wsp, bsp)
    assert out.shape == (B, C, L)
    assert jnp.allclose(out, ref, atol=2e-5, rtol=2e-5), "mismatch vs pure-JAX reference"
    print("KERNEL_OK")
</pallas_src>

<mosaic_0001>
module attributes {stable_mosaic.version = 11 : i64} {
  func.func @cbam_kernel(%arg0: i32, %arg1: memref<2x32x128xf32, #tpu.memory_space<vmem>>, %arg2: memref<2x32xf32, #tpu.memory_space<vmem>>, %arg3: memref<2x32xf32, #tpu.memory_space<vmem>>, %arg4: memref<14xf32, #tpu.memory_space<smem>>, %arg5: memref<1xf32, #tpu.memory_space<smem>>, %arg6: memref<2x32x128xf32, #tpu.memory_space<vmem>>) attributes {dimension_semantics = [#tpu.dimension_semantics<parallel>], iteration_bounds = array<i64: 2>, scalar_prefetch = 0 : i64, scratch_operands = 0 : i64, tpu.core_type = #tpu.core_type<tc>, window_params = [{transform_indices = @transform_0, window_bounds = array<i64: 2, 32, 128>}, {pipeline_mode = #tpu.pipeline_mode<synchronous>, transform_indices = @transform_1, window_bounds = array<i64: 2, 32>}, {pipeline_mode = #tpu.pipeline_mode<synchronous>, transform_indices = @transform_2, window_bounds = array<i64: 2, 32>}, {transform_indices = @transform_3, window_bounds = array<i64: 14>}, {transform_indices = @transform_4, window_bounds = array<i64: 1>}, {transform_indices = @transform_5, window_bounds = array<i64: 2, 32, 128>}]} {
    %c0 = arith.constant 0 : index
    %c0_0 = arith.constant 0 : index
    %c0_1 = arith.constant 0 : index
    %0 = vector.load %arg1[%c0, %c0_0, %c0_1] : memref<2x32x128xf32, #tpu.memory_space<vmem>>, vector<2x32x128xf32>
    %cst = arith.constant dense<0.000000e+00> : vector<2x32xf32>
    %1 = vector.multi_reduction <add>, %0, %cst [2] : vector<2x32x128xf32> to vector<2x32xf32>
    %cst_2 = arith.constant 7.812500e-03 : f32
    %2 = vector.broadcast %cst_2 : f32 to vector<2x32xf32>
    %3 = arith.mulf %1, %2 : vector<2x32xf32>
    %cst_3 = arith.constant dense<0xFF800000> : vector<2x32xf32>
    %4 = vector.multi_reduction <maximumf>, %0, %cst_3 [2] : vector<2x32x128xf32> to vector<2x32xf32>
    %5 = tpu.concatenate %3, %4 in 0 : vector<2x32xf32>, vector<2x32xf32> -> vector<4x32xf32>
    %c0_4 = arith.constant 0 : index
    %c0_5 = arith.constant 0 : index
    %6 = vector.load %arg2[%c0_4, %c0_5] : memref<2x32xf32, #tpu.memory_space<vmem>>, vector<2x32xf32>
    %c0_6 = arith.constant 0 : index
    %c0_7 = arith.constant 0 : index
    %7 = vector.load %arg3[%c0_6, %c0_7] : memref<2x32xf32, #tpu.memory_space<vmem>>, vector<2x32xf32>
    %cst_8 = arith.constant 0.000000e+00 : f32
    %8 = vector.broadcast %cst_8 : f32 to vector<4x32xf32>
    %9 = vector.extract_strided_slice %6 {offsets = [0, 0], sizes = [1, 32], strides = [1, 1]} : vector<2x32xf32> to vector<1x32xf32>
    %10 = vector.broadcast %9 : vector<1x32xf32> to vector<4x32xf32>
    %11 = arith.mulf %5, %10 : vector<4x32xf32>
    %cst_9 = arith.constant dense<0.000000e+00> : vector<4xf32>
    %12 = vector.multi_reduction <add>, %11, %cst_9 [1] : vector<4x32xf32> to vector<4xf32>
    %13 = vector.shape_cast %12 : vector<4xf32> to vector<4x1xf32>
    %cst_10 = arith.constant 0.000000e+00 : f32
    %14 = vector.broadcast %cst_10 : f32 to vector<4x1xf32>
    %15 = arith.maximumf %13, %14 : vector<4x1xf32>
    %16 = vector.extract_strided_slice %7 {offsets = [0, 0], sizes = [1, 32], strides = [1, 1]} : vector<2x32xf32> to vector<1x32xf32>
    %17 = vector.broadcast %15 : vector<4x1xf32> to vector<4x32xf32>
    %18 = vector.broadcast %16 : vector<1x32xf32> to vector<4x32xf32>
    %19 = arith.mulf %17, %18 : vector<4x32xf32>
    %20 = arith.addf %8, %19 : vector<4x32xf32>
    %21 = vector.extract_strided_slice %6 {offsets = [1, 0], sizes = [1, 32], strides = [1, 1]} : vector<2x32xf32> to vector<1x32xf32>
    %22 = vector.broadcast %21 : vector<1x32xf32> to vector<4x32xf32>
    %23 = arith.mulf %5, %22 : vector<4x32xf32>
    %cst_11 = arith.constant dense<0.000000e+00> : vector<4xf32>
    %24 = vector.multi_reduction <add>, %23, %cst_11 [1] : vector<4x32xf32> to vector<4xf32>
    %25 = vector.shape_cast %24 : vector<4xf32> to vector<4x1xf32>
    %cst_12 = arith.constant 0.000000e+00 : f32
    %26 = vector.broadcast %cst_12 : f32 to vector<4x1xf32>
    %27 = arith.maximumf %25, %26 : vector<4x1xf32>
    %28 = vector.extract_strided_slice %7 {offsets = [1, 0], sizes = [1, 32], strides = [1, 1]} : vector<2x32xf32> to vector<1x32xf32>
    %29 = vector.broadcast %27 : vector<4x1xf32> to vector<4x32xf32>
    %30 = vector.broadcast %28 : vector<1x32xf32> to vector<4x32xf32>
    %31 = arith.mulf %29, %30 : vector<4x32xf32>
    %32 = arith.addf %20, %31 : vector<4x32xf32>
    %33 = vector.extract_strided_slice %32 {offsets = [0, 0], sizes = [2, 32], strides = [1, 1]} : vector<4x32xf32> to vector<2x32xf32>
    %34 = vector.extract_strided_slice %32 {offsets = [2, 0], sizes = [2, 32], strides = [1, 1]} : vector<4x32xf32> to vector<2x32xf32>
    %35 = arith.addf %33, %34 : vector<2x32xf32>
    %36 = arith.negf %35 : vector<2x32xf32>
    %37 = math.exp %36 : vector<2x32xf32>
    %cst_13 = arith.constant 1.000000e+00 : f32
    %38 = vector.broadcast %cst_13 : f32 to vector<2x32xf32>
    %39 = arith.addf %38, %37 : vector<2x32xf32>
    %40 = arith.divf %38, %39 : vector<2x32xf32>
    %41 = vector.shape_cast %40 : vector<2x32xf32> to vector<2x32x1xf32>
    %42 = vector.broadcast %41 : vector<2x32x1xf32> to vector<2x32x128xf32>
    %43 = arith.mulf %42, %0 : vector<2x32x128xf32>
    %cst_14 = arith.constant dense<0.000000e+00> : vector<2x128xf32>
    %44 = vector.multi_reduction <add>, %43, %cst_14 [1] : vector<2x32x128xf32> to vector<2x128xf32>
    %cst_15 = arith.constant 3.125000e-02 : f32
    %45 = vector.broadcast %cst_15 : f32 to vector<2x128xf32>
    %46 = arith.mulf %44, %45 : vector<2x128xf32>
    %cst_16 = arith.constant dense<0xFF800000> : vector<2x128xf32>
    %47 = vector.multi_reduction <maximumf>, %43, %cst_16 [1] : vector<2x32x128xf32> to vector<2x128xf32>
    %48 = tpu.concatenate %46, %47 in 0 : vector<2x128xf32>, vector<2x128xf32> -> vector<4x128xf32>
    %49 = tpu.iota {dimensions = array<i32: 1>} : vector<4x128xi32>
    %50 = tpu.iota {dimensions = array<i32: 0>} : vector<4x1xi32>
    %c2_i32 = arith.constant 2 : i32
    %51 = vector.broadcast %c2_i32 : i32 to vector<4x1xi32>
    %52 = arith.cmpi slt, %50, %51 : vector<4x1xi32>
    %c0_17 = arith.constant 0 : index
    %53 = memref.load %arg5[%c0_17] : memref<1xf32, #tpu.memory_space<smem>>
    %cst_18 = arith.constant 0.000000e+00 : f32
    %54 = vector.broadcast %cst_18 : f32 to vector<4x128xf32>
    %c3_i32 = arith.constant 3 : i32
    %55 = tpu.dynamic_rotate %48 by %c3_i32 dim 1 : vector<4x128xf32>, i32 -> vector<4x128xf32>
    %c-3_i32 = arith.constant -3 : i32
    %56 = vector.broadcast %c-3_i32 : i32 to vector<4x128xi32>
    %57 = arith.addi %49, %56 : vector<4x128xi32>
    %c0_i32 = arith.constant 0 : i32
    %58 = vector.broadcast %c0_i32 : i32 to vector<4x128xi32>
    %59 = arith.cmpi sge, %57, %58 : vector<4x128xi32>
    %c-3_i32_19 = arith.constant -3 : i32
    %60 = vector.broadcast %c-3_i32_19 : i32 to vector<4x128xi32>
    %61 = arith.addi %49, %60 : vector<4x128xi32>
    %c128_i32 = arith.constant 128 : i32
    %62 = vector.broadcast %c128_i32 : i32 to vector<4x128xi32>
    %63 = arith.cmpi slt, %61, %62 : vector<4x128xi32>
    %64 = arith.andi %59, %63 : vector<4x128xi1>
    %cst_20 = arith.constant 0.000000e+00 : f32
    %65 = vector.broadcast %cst_20 : f32 to vector<4x128xf32>
    %66 = arith.select %64, %55, %65 : vector<4x128xi1>, vector<4x128xf32>
    %c0_21 = arith.constant 0 : index
    %67 = memref.load %arg4[%c0_21] : memref<14xf32, #tpu.memory_space<smem>>
    %c7 = arith.constant 7 : index
    %68 = memref.load %arg4[%c7] : memref<14xf32, #tpu.memory_space<smem>>
    %69 = vector.broadcast %67 : f32 to vector<4x1xf32>
    %70 = vector.broadcast %68 : f32 to vector<4x1xf32>
    %71 = arith.select %52, %69, %70 : vector<4x1xi1>, vector<4x1xf32>
    %72 = vector.broadcast %71 : vector<4x1xf32> to vector<4x128xf32>
    %73 = arith.mulf %72, %66 : vector<4x128xf32>
    %74 = arith.addf %54, %73 : vector<4x128xf32>
    %c2_i32_22 = arith.constant 2 : i32
    %75 = tpu.dynamic_rotate %48 by %c2_i32_22 dim 1 : vector<4x128xf32>, i32 -> vector<4x128xf32>
    %c-2_i32 = arith.constant -2 : i32
    %76 = vector.broadcast %c-2_i32 : i32 to vector<4x128xi32>
    %77 = arith.addi %49, %76 : vector<4x128xi32>
    %c0_i32_23 = arith.constant 0 : i32
    %78 = vector.broadcast %c0_i32_23 : i32 to vector<4x128xi32>
    %79 = arith.cmpi sge, %77, %78 : vector<4x128xi32>
    %c-2_i32_24 = arith.constant -2 : i32
    %80 = vector.broadcast %c-2_i32_24 : i32 to vector<4x128xi32>
    %81 = arith.addi %49, %80 : vector<4x128xi32>
    %c128_i32_25 = arith.constant 128 : i32
    %82 = vector.broadcast %c128_i32_25 : i32 to vector<4x128xi32>
    %83 = arith.cmpi slt, %81, %82 : vector<4x128xi32>
    %84 = arith.andi %79, %83 : vector<4x128xi1>
    %cst_26 = arith.constant 0.000000e+00 : f32
    %85 = vector.broadcast %cst_26 : f32 to vector<4x128xf32>
    %86 = arith.select %84, %75, %85 : vector<4x128xi1>, vector<4x128xf32>
    %c1 = arith.constant 1 : index
    %87 = memref.load %arg4[%c1] : memref<14xf32, #tpu.memory_space<smem>>
    %c8 = arith.constant 8 : index
    %88 = memref.load %arg4[%c8] : memref<14xf32, #tpu.memory_space<smem>>
    %89 = vector.broadcast %87 : f32 to vector<4x1xf32>
    %90 = vector.broadcast %88 : f32 to vector<4x1xf32>
    %91 = arith.select %52, %89, %90 : vector<4x1xi1>, vector<4x1xf32>
    %92 = vector.broadcast %91 : vector<4x1xf32> to vector<4x128xf32>
    %93 = arith.mulf %92, %86 : vector<4x128xf32>
    %94 = arith.addf %74, %93 : vector<4x128xf32>
    %c1_i32 = arith.constant 1 : i32
    %95 = tpu.dynamic_rotate %48 by %c1_i32 dim 1 : vector<4x128xf32>, i32 -> vector<4x128xf32>
    %c-1_i32 = arith.constant -1 : i32
    %96 = vector.broadcast %c-1_i32 : i32 to vector<4x128xi32>
    %97 = arith.addi %49, %96 : vector<4x128xi32>
    %c0_i32_27 = arith.constant 0 : i32
    %98 = vector.broadcast %c0_i32_27 : i32 to vector<4x128xi32>
    %99 = arith.cmpi sge, %97, %98 : vector<4x128xi32>
    %c-1_i32_28 = arith.constant -1 : i32
    %100 = vector.broadcast %c-1_i32_28 : i32 to vector<4x128xi32>
    %101 = arith.addi %49, %100 : vector<4x128xi32>
    %c128_i32_29 = arith.constant 128 : i32
    %102 = vector.broadcast %c128_i32_29 : i32 to vector<4x128xi32>
    %103 = arith.cmpi slt, %101, %102 : vector<4x128xi32>
    %104 = arith.andi %99, %103 : vector<4x128xi1>
    %cst_30 = arith.constant 0.000000e+00 : f32
    %105 = vector.broadcast %cst_30 : f32 to vector<4x128xf32>
    %106 = arith.select %104, %95, %105 : vector<4x128xi1>, vector<4x128xf32>
    %c2 = arith.constant 2 : index
    %107 = memref.load %arg4[%c2] : memref<14xf32, #tpu.memory_space<smem>>
    %c9 = arith.constant 9 : index
    %108 = memref.load %arg4[%c9] : memref<14xf32, #tpu.memory_space<smem>>
    %109 = vector.broadcast %107 : f32 to vector<4x1xf32>
    %110 = vector.broadcast %108 : f32 to vector<4x1xf32>
    %111 = arith.select %52, %109, %110 : vector<4x1xi1>, vector<4x1xf32>
    %112 = vector.broadcast %111 : vector<4x1xf32> to vector<4x128xf32>
    %113 = arith.mulf %112, %106 : vector<4x128xf32>
    %114 = arith.addf %94, %113 : vector<4x128xf32>
    %c3 = arith.constant 3 : index
    %115 = memref.load %arg4[%c3] : memref<14xf32, #tpu.memory_space<smem>>
    %c10 = arith.constant 10 : index
    %116 = memref.load %arg4[%c10] : memref<14xf32, #tpu.memory_space<smem>>
    %117 = vector.broadcast %115 : f32 to vector<4x1xf32>
    %118 = vector.broadcast %116 : f32 to vector<4x1xf32>
    %119 = arith.select %52, %117, %118 : vector<4x1xi1>, vector<4x1xf32>
    %120 = vector.broadcast %119 : vector<4x1xf32> to vector<4x128xf32>
    %121 = arith.mulf %120, %48 : vector<4x128xf32>
    %122 = arith.addf %114, %121 : vector<4x128xf32>
    %c127_i32 = arith.constant 127 : i32
    %123 = tpu.dynamic_rotate %48 by %c127_i32 dim 1 : vector<4x128xf32>, i32 -> vector<4x128xf32>
    %c1_i32_31 = arith.constant 1 : i32
    %124 = vector.broadcast %c1_i32_31 : i32 to vector<4x128xi32>
    %125 = arith.addi %49, %124 : vector<4x128xi32>
    %c0_i32_32 = arith.constant 0 : i32
    %126 = vector.broadcast %c0_i32_32 : i32 to vector<4x128xi32>
    %127 = arith.cmpi sge, %125, %126 : vector<4x128xi32>
    %c1_i32_33 = arith.constant 1 : i32
    %128 = vector.broadcast %c1_i32_33 : i32 to vector<4x128xi32>
    %129 = arith.addi %49, %128 : vector<4x128xi32>
    %c128_i32_34 = arith.constant 128 : i32
    %130 = vector.broadcast %c128_i32_34 : i32 to vector<4x128xi32>
    %131 = arith.cmpi slt, %129, %130 : vector<4x128xi32>
    %132 = arith.andi %127, %131 : vector<4x128xi1>
    %cst_35 = arith.constant 0.000000e+00 : f32
    %133 = vector.broadcast %cst_35 : f32 to vector<4x128xf32>
    %134 = arith.select %132, %123, %133 : vector<4x128xi1>, vector<4x128xf32>
    %c4 = arith.constant 4 : index
    %135 = memref.load %arg4[%c4] : memref<14xf32, #tpu.memory_space<smem>>
    %c11 = arith.constant 11 : index
    %136 = memref.load %arg4[%c11] : memref<14xf32, #tpu.memory_space<smem>>
    %137 = vector.broadcast %135 : f32 to vector<4x1xf32>
    %138 = vector.broadcast %136 : f32 to vector<4x1xf32>
    %139 = arith.select %52, %137, %138 : vector<4x1xi1>, vector<4x1xf32>
    %140 = vector.broadcast %139 : vector<4x1xf32> to vector<4x128xf32>
    %141 = arith.mulf %140, %134 : vector<4x128xf32>
    %142 = arith.addf %122, %141 : vector<4x128xf32>
    %c126_i32 = arith.constant 126 : i32
    %143 = tpu.dynamic_rotate %48 by %c126_i32 dim 1 : vector<4x128xf32>, i32 -> vector<4x128xf32>
    %c2_i32_36 = arith.constant 2 : i32
    %144 = vector.broadcast %c2_i32_36 : i32 to vector<4x128xi32>
    %145 = arith.addi %49, %144 : vector<4x128xi32>
    %c0_i32_37 = arith.constant 0 : i32
    %146 = vector.broadcast %c0_i32_37 : i32 to vector<4x128xi32>
    %147 = arith.cmpi sge, %145, %146 : vector<4x128xi32>
    %c2_i32_38 = arith.constant 2 : i32
    %148 = vector.broadcast %c2_i32_38 : i32 to vector<4x128xi32>
    %149 = arith.addi %49, %148 : vector<4x128xi32>
    %c128_i32_39 = arith.constant 128 : i32
    %150 = vector.broadcast %c128_i32_39 : i32 to vector<4x128xi32>
    %151 = arith.cmpi slt, %149, %150 : vector<4x128xi32>
    %152 = arith.andi %147, %151 : vector<4x128xi1>
    %cst_40 = arith.constant 0.000000e+00 : f32
    %153 = vector.broadcast %cst_40 : f32 to vector<4x128xf32>
    %154 = arith.select %152, %143, %153 : vector<4x128xi1>, vector<4x128xf32>
    %c5 = arith.constant 5 : index
    %155 = memref.load %arg4[%c5] : memref<14xf32, #tpu.memory_space<smem>>
    %c12 = arith.constant 12 : index
    %156 = memref.load %arg4[%c12] : memref<14xf32, #tpu.memory_space<smem>>
    %157 = vector.broadcast %155 : f32 to vector<4x1xf32>
    %158 = vector.broadcast %156 : f32 to vector<4x1xf32>
    %159 = arith.select %52, %157, %158 : vector<4x1xi1>, vector<4x1xf32>
    %160 = vector.broadcast %159 : vector<4x1xf32> to vector<4x128xf32>
    %161 = arith.mulf %160, %154 : vector<4x128xf32>
    %162 = arith.addf %142, %161 : vector<4x128xf32>
    %c125_i32 = arith.constant 125 : i32
    %163 = tpu.dynamic_rotate %48 by %c125_i32 dim 1 : vector<4x128xf32>, i32 -> vector<4x128xf32>
    %c3_i32_41 = arith.constant 3 : i32
    %164 = vector.broadcast %c3_i32_41 : i32 to vector<4x128xi32>
    %165 = arith.addi %49, %164 : vector<4x128xi32>
    %c0_i32_42 = arith.constant 0 : i32
    %166 = vector.broadcast %c0_i32_42 : i32 to vector<4x128xi32>
    %167 = arith.cmpi sge, %165, %166 : vector<4x128xi32>
    %c3_i32_43 = arith.constant 3 : i32
    %168 = vector.broadcast %c3_i32_43 : i32 to vector<4x128xi32>
    %169 = arith.addi %49, %168 : vector<4x128xi32>
    %c128_i32_44 = arith.constant 128 : i32
    %170 = vector.broadcast %c128_i32_44 : i32 to vector<4x128xi32>
    %171 = arith.cmpi slt, %169, %170 : vector<4x128xi32>
    %172 = arith.andi %167, %171 : vector<4x128xi1>
    %cst_45 = arith.constant 0.000000e+00 : f32
    %173 = vector.broadcast %cst_45 : f32 to vector<4x128xf32>
    %174 = arith.select %172, %163, %173 : vector<4x128xi1>, vector<4x128xf32>
    %c6 = arith.constant 6 : index
    %175 = memref.load %arg4[%c6] : memref<14xf32, #tpu.memory_space<smem>>
    %c13 = arith.constant 13 : index
    %176 = memref.load %arg4[%c13] : memref<14xf32, #tpu.memory_space<smem>>
    %177 = vector.broadcast %175 : f32 to vector<4x1xf32>
    %178 = vector.broadcast %176 : f32 to vector<4x1xf32>
    %179 = arith.select %52, %177, %178 : vector<4x1xi1>, vector<4x1xf32>
    %180 = vector.broadcast %179 : vector<4x1xf32> to vector<4x128xf32>
    %181 = arith.mulf %180, %174 : vector<4x128xf32>
    %182 = arith.addf %162, %181 : vector<4x128xf32>
    %183 = vector.extract_strided_slice %182 {offsets = [0, 0], sizes = [2, 128], strides = [1, 1]} : vector<4x128xf32> to vector<2x128xf32>
    %184 = vector.extract_strided_slice %182 {offsets = [2, 0], sizes = [2, 128], strides = [1, 1]} : vector<4x128xf32> to vector<2x128xf32>
    %185 = arith.addf %183, %184 : vector<2x128xf32>
    %186 = vector.broadcast %53 : f32 to vector<2x128xf32>
    %187 = arith.addf %185, %186 : vector<2x128xf32>
    %188 = arith.negf %187 : vector<2x128xf32>
    %189 = math.exp %188 : vector<2x128xf32>
    %cst_46 = arith.constant 1.000000e+00 : f32
    %190 = vector.broadcast %cst_46 : f32 to vector<2x128xf32>
    %191 = arith.addf %190, %189 : vector<2x128xf32>
    %192 = arith.divf %190, %191 : vector<2x128xf32>
    %193 = vector.shape_cast %192 : vector<2x128xf32> to vector<2x1x128xf32>
    %194 = vector.broadcast %193 : vector<2x1x128xf32> to vector<2x32x128xf32>
    %195 = arith.mulf %194, %43 : vector<2x32x128xf32>
    %c0_47 = arith.constant 0 : index
    %c0_48 = arith.constant 0 : index
    %c0_49 = arith.constant 0 : index
    %196 = vector.load %arg6[%c0_47, %c0_48, %c0_49] : memref<2x32x128xf32, #tpu.memory_space<vmem>>, vector<2x32x128xf32>
    tpu.vector_store %arg6[%c0_47, %c0_48, %c0_49], %195 {strides = array<i32>} : memref<2x32x128xf32, #tpu.memory_space<vmem>>, vector<2x32x128xf32>,
    return
  }
  func.func @transform_0(%arg0: i32) -> (i32, i32, i32) {
    %c0_i32 = arith.constant 0 : i32
    %c0_i32_0 = arith.constant 0 : i32
    %c0_i32_1 = arith.constant 0 : i32
    return %arg0, %c0_i32, %c0_i32_0 : i32, i32, i32
  }
  func.func @transform_1(%arg0: i32) -> (i32, i32) {
    %c0_i32 = arith.constant 0 : i32
    %c0_i32_0 = arith.constant 0 : i32
    %c0_i32_1 = arith.constant 0 : i32
    return %c0_i32, %c0_i32_0 : i32, i32
  }
  func.func @transform_2(%arg0: i32) -> (i32, i32) {
    %c0_i32 = arith.constant 0 : i32
    %c0_i32_0 = arith.constant 0 : i32
    %c0_i32_1 = arith.constant 0 : i32
    return %c0_i32, %c0_i32_0 : i32, i32
  }
  func.func @transform_3(%arg0: i32) -> i32 {
    %c0_i32 = arith.constant 0 : i32
    %c0_i32_0 = arith.constant 0 : i32
    return %c0_i32 : i32
  }
  func.func @transform_4(%arg0: i32) -> i32 {
    %c0_i32 = arith.constant 0 : i32
    %c0_i32_0 = arith.constant 0 : i32
    return %c0_i32 : i32
  }
  func.func @transform_5(%arg0: i32) -> (i32, i32, i32) {
    %c0_i32 = arith.constant 0 : i32
    %c0_i32_0 = arith.constant 0 : i32
    %c0_i32_1 = arith.constant 0 : i32
    return %arg0, %c0_i32, %c0_i32_0 : i32, i32, i32
  }
}

</mosaic_0001>

<bundles_post_ra>
// kernel: tpu_custom_call.1
= control target key start
LH: loop header
LB: loop body
LE: loop exit
PB: predicated region body
PF: predicated region fallthrough
CT: control target
= control target key end

     0   :  { %s1443_s0 = inlined_call_operand.hbm [shape: f32[4,32,128], index: 0, kind: input, shape index: {}]   ;;  %s1444_s1 = inlined_call_operand.vmem [shape: f32[2,32], index: 1, kind: input, shape index: {}]   ;;  %s1445_s2 = inlined_call_operand.hbm [shape: f32[2,32], index: 2, kind: input, shape index: {}]   ;;  %s1446_s3 = inlined_call_operand.vmem [shape: f32[14], index: 3, kind: input, shape index: {}]   ;;  %s1447_s4 = inlined_call_operand.<no memory space> [shape: f32[1], index: 4, kind: input, shape index: {}]   ;;  %s1448_s5 = inlined_call_operand.hbm [shape: f32[4,32,128], index: 5, kind: output, shape index: {}]  }
   0x1   :  { %1449 = sst [smem:[#allocation15_spill]] %s1445_s2 }
   0x2   :  { %10 = sst [smem:[#allocation2]] %s1447_s4 }
   0x3   :  { %11 = vsyncpa [#allocation4], 0 }
   0x4   :  { %13 = vsyncpa [#allocation4 + $0x1], 0 }
   0x5   :  { %14 = vsyncpa [#allocation8], 0 }
   0x6   :  { %15 = vsyncpa [#allocation6], 0 }
   0x7   :  { %16 = vsyncpa [#allocation5], 0 }
   0x8   :  { %18 = vsyncpa [#allocation5 + $0x1], 0  ;;  %s1117_s20 = smov 0   ;;  %s1119_s21 = smov 0  }
   0x9   :  { %s1121_s22 = smov 0   ;;  %s1123_s23 = smov 0  }
   0xa LB: > { %s1138_s4 = sadd.s32 4294967295, %s1070_s23   ;;  %s789_s24 = sadd.s32 4294967294, %s1070_s23   ;;  %s1070_s23 = sphi %s1123_s23, %s1461_s23   ;;  %s1066_s22 = sphi %s1121_s22, %s1460_s22   ;;  %s1062_s21 = sphi %s1119_s21, %s1459_s21   ;;  %s1058_s20 = sphi %s1117_s20, %s1458_s20  }
   0xb   : > { %s1142_s25 = sadd.s32 1, %s1070_s23   ;;  %s31_s26 = sadd.s32 1, %s1066_s22 }
   0xc   : > { %s28_s27 = ssub.s32 %s1070_s23, %s1142_s25  ;;  %p38_p0 = scmp.ne.s32.totalorder %s1066_s22, %s1062_s21 }
   0xd   : > { %p29_p1 = scmp.eq.s32.totalorder %s28_s27, 0  ;;  %p39_p2 = scmp.eq.s32.totalorder %s1070_s23, 0 }
   0xe   : > { %p44_p3 = scmp.ne.s32.totalorder %s1062_s21, %s1058_s20  ;;  %p45_p4 = scmp.eq.s32.totalorder %s1138_s4, 0 }
   0xf   : > { %s1154_s28 = scalar_select %p29_p1, %s1066_s22, %s31_s26  }
  0x10   : > { %p1156_p5 = por %p39_p2, %p38_p0  ;;  %p1162_p6 = por %p45_p4, %p44_p3 }
  0x11   : > { %p152_p7 = scmp.eq.s32.totalorder %s1138_s4, 1  ;;  %p158_p8 = scmp.eq.s32.totalorder %s789_s24, 1 }
  0x12   : > { %p790_p9 = scmp.ge.s32.totalorder %s1070_s23, 1  ;;  %p165_p10 = scmp.lt.s32.totalorder %s1070_s23, 3 }
  0x13   : > { %p1169_p11 = por %p152_p7, %p38_p0  ;;  %p1173_p12 = por %p158_p8, %p44_p3 }
  0x14   : > { %p1177_p13 = pnand %p790_p9, %p165_p10  ;;  %s1455_s2 = sld [smem:[#allocation15_spill]] }
  0x15   : > { %s1072_s12 = smov [#allocation7]   ;;  %p857_p3 = scmp.lt.s32.totalorder %s1070_s23, 2 }
  0x16   : > { %p840_p1 = pneg %p1177_p13  ;;  %s182_s13 = sshll.u32 %s1072_s12, 4  ;;  %s183_s13 = int_to_ptr.vmem [resolvable:$true] %s182_s13 }
  0x17   : > { %s192_s16 = sshll.u32 %s1446_s3, 4  ;;  %p1195_p7 = pnand %p857_p3, %p1156_p5  ;;  %s193_s16 = int_to_ptr.vmem [resolvable:$true] %s192_s16 }
  0x18   : > { %p841_p2 = pnand %p840_p1, %p45_p4  ;;  %s1073_s18 = smov [#allocation9]  }
  0x19   : > { %s206_s19 = sand.u32 1, %s1066_s22   ;;  %s825_s26 = sshll.u32 %s1070_s23, 6 }
  0x1a   : > { %s180_s11 = sshll.u32 %s1455_s2, 4  ;;  %s794_s24 = sshll.u32 %s206_s19, 6  ;;  %s181_s11 = int_to_ptr.hbm [resolvable:$true] %s180_s11 }
  0x1b   : > { %843 = dma.hbm_to_vmem [thread:$0]  (!%p841_p2), %s181_s11, 32, %s183_s13, [#allocation8]  }
  0x1c   : > { %846 = dma.vmem_to_smem (!%p841_p2), %s193_s16, 16, %s1073_s18, [#allocation6]  }
  0x1d   : > { %s216_s10 = scalar_lea.hbm %s1443_s0, %s825_s26  ;;  %s210_s12 = scalar_lea.vmem [#allocation3], %s794_s24 }
  0x1e   : > { %s219_s14 = sshll.u32 %s210_s12, 4  ;;  %s217_s15 = sshll.u32 %s216_s10, 4  ;;  %s220_s14 = int_to_ptr.vmem [resolvable:$true] %s219_s14  ;;  %s218_s15 = int_to_ptr.hbm [resolvable:$true] %s217_s15 }
  0x1f   : > { %s207_s29 = scalar_lea.sflag [#allocation4], %s206_s19  ;;  %s966_s11 = sshra.s32 %s218_s15, 4  ;;  %s967_s11 = int_to_ptr.hbm [resolvable:$true] %s966_s11 }
  0x20   : > { %s968_s13 = scalar_lea.hbm %s967_s11, 64  ;;  %p970_p8 = pneg %p1195_p7 }
  0x21   : > { %p969_p5 = scmp.ne.s32.totalorder %s967_s11, %s968_s13  ;;  %s973_s2 = scalar_lea.hbm %s1443_s0, 128 }
  0x22   : > { %p974_p1 = scmp.lt.s32.totalorder %s967_s11, %s1443_s0  ;;  %p975_p2 = scmp.lt.s32.totalorder %s973_s2, %s968_s13 }
  0x23   : > { %p971_p9 = pnand %p970_p8, %p969_p5 }
  0x24   : > { %p976_p3 = por %p975_p2, %p974_p1 }
  0x25   : > { %p972_p10 = pneg %p971_p9 }
  0x27   : > { %p977_p0 = pnand %p976_p3, %p972_p10 }
  0x29   : > { %980 = shalt.err (!%p977_p0)
}
  0x2a   : > { %s1074_s19 = smov 128   ;;  %s1075_s24 = smov 8  }
  0x2b   : > { %850 = dma.hbm_to_vmem [thread:$0]  (!%p1195_p7), %s218_s15, 1024, %s220_s14, %s207_s29, %s1074_s19, %s1074_s19, %s1075_s24  }
  0x2c   : > { %231 = sbr.rel (%p1177_p13) target bundleno = 726 (0x2d6), region = 40  ;;  %s1217_s9 = sand.u32 (!%p1177_p13), 1, %s1062_s21  }
  0x2d   : > { %s799_s10 = sshll.u32 (!%p1177_p13), %s1217_s9, 6  ;;  %s234_s2 = scalar_lea.sflag (!%p1177_p13), [#allocation4], %s1217_s9 }
  0x2e   : > { %s237_s12 = scalar_lea.vmem (!%p1177_p13), [#allocation3], %s799_s10 }
  0x31   : > { %1041 = dma.done.wait (%p1162_p6), %s234_s2, 1024  }
  0x32   : > { %1043 = vsyncadd (%p1162_p6), %s234_s2, 4294966272 }
  0x33   : > { %1045 = dma.done.wait (%p45_p4), [#allocation8], 32  }
  0x34   : > { %1047 = vsyncadd (%p45_p4), [#allocation8], 4294967264 }
  0x35   : > { %1049 = dma.done.wait (%p45_p4), [#allocation6], 16  }
  0x36   : > { %1051 = vsyncadd (%p45_p4), [#allocation6], 4294967280 }
  0x37   : > { %253 = sfence }
  0x38   : > { %v1235_v0 = vld [vmem:[%s237_s12 + $0x20] sm:$0xff]  ;;  %v1239_v2 = vld [vmem:[%s237_s12 + $0x10] sm:$0xff]  ;;  %v1244_v3 = vld [vmem:[%s237_s12 + $0x28] sm:$0xff]  ;;  %v334_v17 = vlaneseq  ;;  %vm339_vm0 = vcmask 130112   ;;  %vm343_vm1 = vcmask 195712   ;;  %vm347_vm2 = vcmask 261312  }
  0x39   : > { %v1237_v1 = vld [vmem:[%s237_s12] sm:$0xff]  ;;  %294 = vadd.xlane.f32.xlu1 %v1235_v0  ;;  %290 = vadd.xlane.f32.xlu2 %v1239_v2  ;;  %v1246_v4 = vld [vmem:[%s237_s12 + $0x8] sm:$0xff]  ;;  %v1248_v5 = vld [vmem:[%s237_s12 + $0x30] sm:$0xff]  ;;  %vm356_vm3 = vcmask 1041409   ;;  %vm381_vm4 = vcmask 1043459   ;;  %vm384_vm5 = vcmask 1041408  }
  0x3a   : > { %286 = vadd.xlane.f32.xlu0 %v1237_v1  ;;  %v1253_v6 = vld [vmem:[%s237_s12 + $0x38] sm:$0xff]  ;;  %v1268_v21 = vand.u32 127, %v334_v17  ;;  %v386_v55 = vld [vmem:[%s1444_s1] sm:$0x3]  ;;  %vm390_vm6 = vcmask 257024   ;;  %s1076_s17 = smov 126  }
  0x3b   : > { %v1255_v7 = vld [vmem:[%s237_s12 + $0x18] sm:$0xff]  ;;  %s1077_s14 = smov 2   ;;  %s1078_s15 = smov 3  }
  0x3c   : > { %v337_v23 = vadd.s32 4294967288, %v1268_v21  ;;  %v341_v27 = vadd.s32 4294967280, %v1268_v21  ;;  %v345_v31 = vadd.s32 4294967272, %v1268_v21  ;;  %s1079_s29 = smov 127   ;;  %s1080_s11 = smov 1  }
  0x3d   : > { %s1081_s13 = smov 125   ;;  %s546_s16 = sld [smem:[#allocation9]] }
  0x3e   : > { %s804_s18 = sld [smem:[#allocation9 + $0x7]] }
  0x3f   : > { %s805_s27 = sld [smem:[#allocation9 + $0x1]] }
  0x40   : > { %s806_s26 = sld [smem:[#allocation9 + $0x8]] }
  0x41   : > { %296 = vadd.xlane.f32.xlu1 %v1244_v3  ;;  %298 = vadd.xlane.f32.xlu2 %v1248_v5  ;;  %s807_s19 = sld [smem:[#allocation9 + $0x2]] }
  0x42   : > { %288 = vadd.xlane.f32.xlu0 %v1246_v4  ;;  %s808_s24 = sld [smem:[#allocation9 + $0x9]] }
  0x43   : > { %s1355_s2 = sld [smem:[#allocation9 + $0x3]] }
  0x44   : > { %s1357_s12 = sld [smem:[#allocation9 + $0xa]] }
  0x45   : > { %s1361_s30 = sld [smem:[#allocation9 + $0x4]] }
  0x46   : > { %s1363_s8 = sld [smem:[#allocation9 + $0xb]] }
  0x49   : > { %300 = vadd.xlane.f32.xlu1 %v1253_v6  ;;  %310 = vmax.xlane.f32.xlu2 %v1237_v1 }
  0x4a   : > { %292 = vadd.xlane.f32.xlu0 %v1255_v7 }
  0x51   : > { %318 = vmax.xlane.f32.xlu1 %v1235_v0  ;;  %320 = vmax.xlane.f32.xlu2 %v1244_v3 }
  0x52   : > { %312 = vmax.xlane.f32.xlu0 %v1246_v4 }
  0x59   : > { %322 = vmax.xlane.f32.xlu1 %v1248_v5  ;;  %316 = vmax.xlane.f32.xlu2 %v1255_v7 }
  0x5a   : > { %314 = vmax.xlane.f32.xlu0 %v1239_v2 }
  0x62   : > { %324 = vmax.xlane.f32.xlu0 %v1253_v6 }
  0xac   : > { %v295_v8 = vpop.xlane.xlu1 %294  ;;  %v291_v10 = vpop.xlane.xlu2 %290 }
  0xad   : > { %v287_v9 = vpop.xlane.xlu0 %286  ;;  %v306_v22 = vmul.f32 0.0078125, %v295_v8  ;;  %v304_v29 = vmul.f32 0.0078125, %v291_v10  ;;  %v398_v8 = vperm.slane %v386_v55, 1 }
  0xae   : > { %v302_v26 = vmul.f32 0.0078125, %v287_v9  ;;  %v388_v9 = vperm.slane %v386_v55, 0 }
  0xaf   : > { %v349_v28 = vperm.slane %v306_v22, %v1268_v21  ;;  %v342_v43 = vperm.slane %v304_v29, %v341_v27 }
  0xb0   : > { %v336_v37 = vperm.slane %v302_v26, %v1268_v21 }
  0xb4   : > { %v297_v11 = vpop.xlane.xlu1 %296  ;;  %v299_v13 = vpop.xlane.xlu2 %298 }
  0xb5   : > { %v289_v12 = vpop.xlane.xlu0 %288  ;;  %v307_v24 = vmul.f32 0.0078125, %v297_v11  ;;  %v308_v30 = vmul.f32 0.0078125, %v299_v13 }
  0xb6   : > { %v303_v25 = vmul.f32 0.0078125, %v289_v12 }
  0xb7   : > { %v350_v33 = vperm.slane %v307_v24, %v337_v23  ;;  %v352_v44 = vperm.slane %v308_v30, %v341_v27 }
  0xb8   : > { %v338_v34 = vperm.slane %v303_v25, %v337_v23 }
  0xb9   : > { %v351_v47 = vsel %vm339_vm0, %v350_v33, %v349_v28 }
  0xba   : > { %v340_v48 = vsel %vm339_vm0, %v338_v34, %v336_v37  ;;  %v353_v56 = vsel %vm343_vm1, %v352_v44, %v351_v47 }
  0xbb   : > { %v344_v57 = vsel %vm343_vm1, %v342_v43, %v340_v48 }
  0xbc   : > { %v301_v14 = vpop.xlane.xlu1 %300  ;;  %v311_v16 = vpop.xlane.xlu2 %310 }
  0xbd   : > { %v293_v15 = vpop.xlane.xlu0 %292  ;;  %v309_v35 = vmul.f32 0.0078125, %v301_v14  ;;  %v367_v38 = vperm.slane %v311_v16, %v1268_v21 }
  0xbe   : > { %v305_v36 = vmul.f32 0.0078125, %v293_v15 }
  0xbf   : > { %v354_v49 = vperm.slane %v309_v35, %v345_v31 }
  0xc0   : > { %v346_v50 = vperm.slane %v305_v36, %v345_v31 }
  0xc1   : > { %v355_v60 = vsel %vm347_vm2, %v354_v49, %v353_v56 }
  0xc2   : > { %v348_v61 = vsel %vm347_vm2, %v346_v50, %v344_v57 }
  0xc3   : > { %v357_v12 = vsel %vm356_vm3, %v355_v60, %v348_v61 }
  0xc4   : > { %v319_v19 = vpop.xlane.xlu1 %318  ;;  %v321_v20 = vpop.xlane.xlu2 %320 }
  0xc5   : > { %v313_v18 = vpop.xlane.xlu0 %312  ;;  %v374_v39 = vperm.slane %v319_v19, %v1268_v21  ;;  %v375_v41 = vperm.slane %v321_v20, %v337_v23  ;;  %v1296_v20 = vshrl.u32 %v334_v17, 7 }
  0xc6   : > { %v368_v40 = vperm.slane %v313_v18, %v337_v23  ;;  %v387_v23 = vld [vmem:[#allocation7] sm:$0x3] }
  0xc7   : > { %v376_v53 = vsel %vm339_vm0, %v375_v41, %v374_v39  ;;  %907 = vset.pattern.permute.xlu2 %v1296_v20  ;;  %905 = vset.pattern.permute.xlu0 %v1296_v20  ;;  %v439_v22 = vadd.s32 8, %v1296_v20  ;;  %v404_v24 = vperm.slane %v387_v23, 1  ;;  %v395_v25 = vperm.slane %v387_v23, 0 }
  0xc8   : > { %v369_v52 = vsel %vm339_vm0, %v368_v40, %v367_v38  ;;  %v445_v49 = vadd.s32 16, %v1296_v20  ;;  %v451_v50 = vadd.s32 24, %v1296_v20  ;;  %vm537_vm12 = vcmp.lt.s32.totalorder %v1296_v20, 2 }
  0xc9   : > { %906 = vset.pattern.permute.xlu1 %v439_v22 }
  0xcc   : > { %v323_v42 = vpop.xlane.xlu1 %322  ;;  %v317_v46 = vpop.xlane.xlu2 %316 }
  0xcd   : > { %v315_v32 = vpop.xlane.xlu0 %314  ;;  %v377_v51 = vperm.slane %v323_v42, %v341_v27  ;;  %v372_v54 = vperm.slane %v317_v46, %v345_v31 }
  0xce   : > { %v370_v45 = vperm.slane %v315_v32, %v341_v27 }
  0xcf   : > { %v378_v63 = vsel %vm343_vm1, %v377_v51, %v376_v53 }
  0xd0   : > { %v371_v58 = vsel %vm343_vm1, %v370_v45, %v369_v52 }
  0xd1   : > { %v373_v10 = vsel %vm347_vm2, %v372_v54, %v371_v58 }
  0xd5   : > { %v325_v59 = vpop.xlane.xlu0 %324 }
  0xd6   : > { %v379_v62 = vperm.slane %v325_v59, %v345_v31 }
  0xd8   : > { %v380_v11 = vsel %vm347_vm2, %v379_v62, %v378_v63 }
  0xd9   : > { %v382_v13 = vsel %vm381_vm4, %v380_v11, %v373_v10 }
  0xda   : > { %v385_v14 = vsel %vm384_vm5, %v357_v12, %v382_v13 }
  0xdb   : > { %v399_v15 = vmul.f32 %v398_v8, %v385_v14  ;;  %v389_v16 = vmul.f32 %v388_v9, %v385_v14 }
  0xdd   : > { %v400_v18 = vsel %vm390_vm6, %v399_v15, 0.0  ;;  %v391_v19 = vsel %vm390_vm6, %v389_v16, 0.0 }
  0xde   : > { %401 = vadd.xlane.f32.xlu2 %v400_v18  ;;  %392 = vadd.xlane.f32.xlu1 %v391_v19 }
 0x151   : > { %v402_v26 = vpop.xlane.xlu2 %401  ;;  %v393_v27 = vpop.xlane.xlu1 %392 }
 0x152   : > { %v403_v28 = vmax.f32 %v402_v26, 0.0  ;;  %v394_v29 = vmax.f32 %v393_v27, 0.0 }
 0x154   : > { %v405_v30 = vmul.f32 %v404_v24, %v403_v28  ;;  %v396_v31 = vmul.f32 %v395_v25, %v394_v29 }
 0x156   : > { %v406_v32 = vadd.f32 %v405_v30, %v396_v31 }
 0x158   : > { %v408_v33 = vrot.slane %v406_v32, 2 }
 0x15a   : > { %v410_v17 = vadd.f32 %v408_v33, %v406_v32 }
 0x15c   : > { %v803_v34 = vmul.f32 -1.442695, %v410_v17 }
 0x15e   : > { %913 = vpow2.f32 %v803_v34 }
 0x164   : > { %v914_v35 = vpop.eup %913 }
 0x165   : > { %v414_v36 = vadd.f32 1.0, %v914_v35 }
 0x167   : > { %915 = vrcp.f32 %v414_v36  ;;  %v426_v40 = vand.u32 2147483648, %v414_v36  ;;  %v424_v42 = vand.u32 2147483647, %v414_v36  ;;  %vm420_vm8 = vweird.f32 %v414_v36 }
 0x169   : > { %v427_v44 = vor.u32 1.1754944e-38, %v426_v40  ;;  %vm425_vm10 = vcmp.eq.f32.partialorder %v424_v42, 8.507059e+37 }
 0x16d   : > { %v916_v37 = vpop.eup %915 }
 0x16e   : > { %v416_v38 = vmul.f32 %v916_v37, %v414_v36  ;;  %vm421_vm7 = vweird.f32 %v916_v37 }
 0x16f   : > { %vm422_vm9 = vmor %vm420_vm8, %vm421_vm7 }
 0x170   : > { %v417_v39 = vsub.f32 1.0, %v416_v38 }
 0x172   : > { %v418_v41 = vmul.f32 %v916_v37, %v417_v39 }
 0x174   : > { %v419_v43 = vadd.f32 %v916_v37, %v418_v41 }
 0x176   : > { %v423_v45 = vsel %vm422_vm9, %v916_v37, %v419_v43 }
 0x177   : > { %v428_v46 = vsel %vm425_vm10, %v427_v44, %v423_v45 }
 0x178   : > { %v455_v47 = vperm.slane %v428_v46, 1  ;;  %v430_v48 = vperm.slane %v428_v46, 0 }
 0x17a   : > { %460 = vperm.xlu2 %907, %v455_v47   ;;  %441 = vperm.xlu1 %906, %v430_v48  }
 0x17b   : > { %435 = vperm.xlu0 %905, %v430_v48  }
 0x182   : > { %908 = vset.pattern.permute.xlu2 %v439_v22  ;;  %909 = vset.pattern.permute.xlu1 %v445_v49 }
 0x183   : > { %912 = vset.pattern.permute.xlu0 %v451_v50 }
 0x18a   : > { %466 = vperm.xlu2 %908, %v455_v47   ;;  %447 = vperm.xlu1 %909, %v430_v48  }
 0x18b   : > { %478 = vperm.xlu0 %912, %v455_v47  }
 0x192   : > { %910 = vset.pattern.permute.xlu2 %v445_v49  ;;  %911 = vset.pattern.permute.xlu1 %v451_v50  ;;  %v555_v49 = vadd.s32 4294967294, %v1268_v21  ;;  %v548_v50 = vstv %s546_s16 }
 0x194   : > { %vm556_vm14 = vcmp.ge.s32.totalorder %v555_v49, 0 }
 0x19a   : > { %472 = vperm.xlu2 %910, %v455_v47   ;;  %453 = vperm.xlu1 %911, %v430_v48   ;;  %v541_v47 = vadd.s32 4294967293, %v1268_v21  ;;  %v569_v48 = vadd.s32 4294967295, %v1268_v21 }
 0x19c   : > { %vm542_vm11 = vcmp.ge.s32.totalorder %v541_v47, 0  ;;  %vm570_vm13 = vcmp.ge.s32.totalorder %v569_v48, 0 }
 0x1d4   : > { %v461_v51 = vpop.permute.xlu2 %460 }
 0x1d5   : > { %v1307_v56 = vmul.f32 %v461_v51, %v1235_v0  ;;  %v549_v51 = vstv %s804_s18 }
 0x1e4   : > { %v467_v52 = vpop.permute.xlu2 %466 }
 0x1e5   : > { %v1304_v55 = vmul.f32 %v467_v52, %v1244_v3  ;;  %v562_v52 = vstv %s805_s27 }
 0x1e7   : > { %v497_v59 = vadd.f32 %v1304_v55, %v1307_v56 }
 0x1ec   : > { %v442_v58 = vpop.permute.xlu1 %441 }
 0x1ed   : > { %v436_v53 = vpop.permute.xlu0 %435  ;;  %v1324_v10 = vmul.f32 %v442_v58, %v1246_v4  ;;  %v577_v58 = vstv %s808_s24 }
 0x1ee   : > { %v1327_v11 = vmul.f32 %v436_v53, %v1237_v1  ;;  %v563_v53 = vstv %s806_s26  ;;  %s275_s26 = scalar_lea.vmem [#allocation10], %s799_s10  ;;  %s678_s10 = scalar_lea.sflag [#allocation5], %s1217_s9 }
 0x1f0   : > { %v488_v14 = vadd.f32 %v1324_v10, %v1327_v11 }
 0x1f4   : > { %v473_v54 = vpop.permute.xlu2 %472 }
 0x1f5   : > { %v1310_v57 = vmul.f32 %v473_v54, %v1248_v5  ;;  %v576_v54 = vstv %s807_s19 }
 0x1f7   : > { %v498_v62 = vadd.f32 %v497_v59, %v1310_v57  ;;  %v517_v0 = vmax.f32 %v1307_v56, %v1310_v57 }
 0x1fc   : > { %v448_v5 = vpop.permute.xlu1 %447 }
 0x1fd   : > { %v479_v60 = vpop.permute.xlu0 %478 }
 0x1fe   : > { %v1315_v61 = vmul.f32 %v479_v60, %v1253_v6  ;;  %v1330_v6 = vmul.f32 %v448_v5, %v1239_v2  ;;  %v550_v60 = vsel %vm537_vm12, %v548_v50, %v549_v51  ;;  %v578_v5 = vsel %vm537_vm12, %v576_v54, %v577_v58 }
 0x200   : > { %v499_v63 = vadd.f32 %v498_v62, %v1315_v61  ;;  %v518_v3 = vmax.f32 %v1304_v55, %v1315_v61  ;;  %v489_v16 = vadd.f32 %v488_v14, %v1330_v6  ;;  %v508_v1 = vmax.f32 %v1327_v11, %v1330_v6 }
 0x201   : > { %v604_v14 = vadd.s32 2, %v1268_v21 }
 0x202   : > { %v500_v8 = vrot.slane %v499_v63, 4  ;;  %v519_v9 = vmax.f32 %v517_v0, %v518_v3  ;;  %v583_v0 = vstv %s1355_s2 }
 0x203   : > { %vm606_vm15 = vcmp.lt.s32.totalorder %v604_v14, 128 }
 0x204   : > { %v501_v12 = vadd.f32 %v500_v8, %v499_v63  ;;  %v520_v13 = vrot.slane %v519_v9, 4  ;;  %v564_v63 = vsel %vm537_vm12, %v562_v52, %v563_v53 }
 0x206   : > { %v502_v18 = vrot.slane %v501_v12, 2  ;;  %v521_v19 = vmax.f32 %v519_v9, %v520_v13 }
 0x208   : > { %v503_v23 = vadd.f32 %v502_v18, %v501_v12  ;;  %v522_v24 = vrot.slane %v521_v19, 2  ;;  %v584_v12 = vstv %s1357_s12  ;;  %v618_v18 = vadd.s32 3, %v1268_v21 }
 0x20a   : > { %v504_v29 = vrot.slane %v503_v23, 1  ;;  %v523_v30 = vmax.f32 %v521_v19, %v522_v24  ;;  %v585_v24 = vsel %vm537_vm12, %v583_v0, %v584_v12  ;;  %vm620_vm1 = vcmp.lt.s32.totalorder %v618_v18, 128 }
 0x20c   : > { %v454_v15 = vpop.permute.xlu1 %453  ;;  %v505_v17 = vadd.f32 %v504_v29, %v503_v23  ;;  %v524_v34 = vrot.slane %v523_v30, 1 }
 0x20d   : > { %v1336_v22 = vmul.f32 %v454_v15, %v1255_v7 }
 0x20e   : > { %v507_v39 = vmul.f32 0.03125, %v505_v17  ;;  %v525_v40 = vmax.f32 %v523_v30, %v524_v34 }
 0x20f   : > { %v490_v4 = vadd.f32 %v489_v16, %v1336_v22  ;;  %v509_v2 = vmax.f32 %v1324_v10, %v1336_v22  ;;  %v590_v16 = vadd.s32 1, %v1268_v21 }
 0x211   : > { %v491_v25 = vrot.slane %v490_v4, 4  ;;  %v510_v26 = vmax.f32 %v508_v1, %v509_v2  ;;  %v598_v2 = vstv %s1363_s8  ;;  %vm592_vm0 = vcmp.lt.s32.totalorder %v590_v16, 128  ;;  %s1016_s8 = scalar_lea.hbm %s1448_s5, 128 }
 0x213   : > { %v492_v27 = vadd.f32 %v491_v25, %v490_v4  ;;  %v511_v28 = vrot.slane %v510_v26, 4  ;;  %v597_v4 = vstv %s1361_s30 }
 0x215   : > { %v493_v31 = vrot.slane %v492_v27, 2  ;;  %v512_v32 = vmax.f32 %v510_v26, %v511_v28  ;;  %v599_v28 = vsel %vm537_vm12, %v597_v4, %v598_v2 }
 0x217   : > { %v494_v7 = vadd.f32 %v493_v31, %v492_v27  ;;  %v513_v33 = vrot.slane %v512_v32, 2 }
 0x219   : > { %v495_v35 = vrot.slane %v494_v7, 1  ;;  %v514_v36 = vmax.f32 %v512_v32, %v513_v33 }
 0x21b   : > { %v496_v37 = vadd.f32 %v495_v35, %v494_v7  ;;  %v515_v38 = vrot.slane %v514_v36, 1 }
 0x21d   : > { %v506_v41 = vmul.f32 0.03125, %v496_v37  ;;  %v516_v42 = vmax.f32 %v514_v36, %v515_v38 }
 0x21f   : > { %v528_v43 = vsel %vm356_vm3, %v507_v39, %v506_v41  ;;  %v532_v44 = vsel %vm381_vm4, %v525_v40, %v516_v42 }
 0x220   : > { %v1346_v45 = vsel %vm384_vm5, %v528_v43, %v532_v44 }
 0x221   : > { %602 = vrot.lane.b32.xlu0 %v1346_v45, %s1076_s17  ;;  %553 = vrot.lane.b32.xlu1 %v1346_v45, %s1077_s14  ;;  %s1366_s17 = sld [smem:[#allocation9 + $0x5]]  ;;  %v586_v32 = vmul.f32 %v585_v24, %v1346_v45 }
 0x222   : > { %539 = vrot.lane.b32.xlu2 %v1346_v45, %s1078_s15  ;;  %s1368_s14 = sld [smem:[#allocation9 + $0xc]] }
 0x223   : > { %s1372_s15 = sld [smem:[#allocation9 + $0x6]] }
 0x227   : > { %v611_v23 = vstv %s1366_s17 }
 0x228   : > { %v612_v25 = vstv %s1368_s14 }
 0x229   : > { %588 = vrot.lane.b32.xlu1 %v1346_v45, %s1079_s29  ;;  %s1376_s29 = sld [smem:[#allocation9 + $0xd]]  ;;  %v625_v29 = vstv %s1372_s15  ;;  %v613_v7 = vsel %vm537_vm12, %v611_v23, %v612_v25 }
 0x22a   : > { %567 = vrot.lane.b32.xlu2 %v1346_v45, %s1080_s11  ;;  %s538_s11 = sld [smem:[#allocation2]] }
 0x22f   : > { %v626_v30 = vstv %s1376_s29 }
 0x230   : > { %v627_v36 = vsel %vm537_vm12, %v625_v29, %v626_v30  ;;  %v634_v44 = vstv %s538_s11 }
 0x232   : > { %616 = vrot.lane.b32.xlu2 %v1346_v45, %s1081_s13  ;;  %s827_s13 = sshll.u32 %s1138_s4, 6  ;;  %s691_s4 = sshll.u32 %s275_s26, 4  ;;  %s692_s4 = int_to_ptr.vmem [resolvable:$true] %s691_s4 }
 0x233   : > { %s690_s27 = scalar_lea.hbm %s1448_s5, %s827_s13 }
 0x234   : > { %s693_s19 = sshll.u32 %s690_s27, 4  ;;  %s694_s19 = int_to_ptr.hbm [resolvable:$true] %s693_s19 }
 0x235   : > { %s1010_s24 = sshra.s32 %s694_s19, 4  ;;  %s1011_s24 = int_to_ptr.hbm [resolvable:$true] %s1010_s24 }
 0x236   : > { %s1012_s2 = scalar_lea.hbm %s1011_s24, 64  ;;  %p1017_p0 = scmp.lt.s32.totalorder %s1011_s24, %s1448_s5 }
 0x237   : > { %p1013_p4 = scmp.ne.s32.totalorder %s1011_s24, %s1012_s2  ;;  %p1018_p7 = scmp.lt.s32.totalorder %s1016_s8, %s1012_s2 }
 0x239   : > { %p1014_p6 = pnand %p1013_p4, %p1169_p11  ;;  %p1019_p5 = por %p1018_p7, %p1017_p0 }
 0x23b   : > { %p1015_p13 = pneg %p1014_p6 }
 0x23d   : > { %p1020_p8 = pnand %p1019_p5, %p1015_p13 }
 0x27c   : > { %v540_v46 = vpop.permute.xlu2 %539 }
 0x27d   : > { %v545_v62 = vsel %vm542_vm11, %v540_v46, 0.0 }
 0x27e   : > { %v551_v13 = vmul.f32 %v550_v60, %v545_v62 }
 0x284   : > { %v568_v59 = vpop.permute.xlu2 %567 }
 0x285   : > { %v573_v8 = vsel %vm570_vm13, %v568_v59, 0.0 }
 0x286   : > { %v579_v19 = vmul.f32 %v578_v5, %v573_v8 }
 0x28c   : > { %v617_v21 = vpop.permute.xlu2 %616 }
 0x28d   : > { %v622_v37 = vsel %vm620_vm1, %v617_v21, 0.0 }
 0x28e   : > { %v628_v40 = vmul.f32 %v627_v36, %v622_v37 }
 0x293   : > { %v554_v3 = vpop.permute.xlu1 %553  ;;  %v603_v26 = vpop.permute.xlu0 %602 }
 0x294   : > { %v559_v9 = vsel %vm556_vm14, %v554_v3, 0.0  ;;  %v608_v33 = vsel %vm606_vm15, %v603_v26, 0.0 }
 0x295   : > { %v565_v15 = vmul.f32 %v564_v63, %v559_v9  ;;  %v614_v38 = vmul.f32 %v613_v7, %v608_v33 }
 0x297   : > { %v566_v1 = vadd.f32 %v565_v15, %v551_v13 }
 0x299   : > { %v580_v27 = vadd.f32 %v579_v19, %v566_v1 }
 0x29b   : > { %v589_v31 = vpop.permute.xlu1 %588  ;;  %v587_v34 = vadd.f32 %v586_v32, %v580_v27 }
 0x29c   : > { %v594_v17 = vsel %vm592_vm0, %v589_v31, 0.0 }
 0x29d   : > { %v600_v35 = vmul.f32 %v599_v28, %v594_v17 }
 0x29f   : > { %v601_v39 = vadd.f32 %v600_v35, %v587_v34 }
 0x2a1   : > { %v615_v41 = vadd.f32 %v614_v38, %v601_v39 }
 0x2a3   : > { %v629_v42 = vadd.f32 %v628_v40, %v615_v41 }
 0x2a5   : > { %v631_v43 = vrot.slane %v629_v42, 2 }
 0x2a7   : > { %v633_v45 = vadd.f32 %v631_v43, %v629_v42 }
 0x2a9   : > { %v635_v46 = vadd.f32 %v634_v44, %v633_v45 }
 0x2ab   : > { %v817_v47 = vmul.f32 -1.442695, %v635_v46 }
 0x2ad   : > { %917 = vpow2.f32 %v817_v47 }
 0x2b3   : > { %v918_v48 = vpop.eup %917 }
 0x2b4   : > { %v639_v49 = vadd.f32 1.0, %v918_v48 }
 0x2b6   : > { %919 = vrcp.f32 %v639_v49  ;;  %v651_v52 = vand.u32 2147483648, %v639_v49  ;;  %v649_v54 = vand.u32 2147483647, %v639_v49  ;;  %vm645_vm3 = vweird.f32 %v639_v49 }
 0x2b8   : > { %v652_v59 = vor.u32 1.1754944e-38, %v651_v52  ;;  %vm650_vm5 = vcmp.eq.f32.partialorder %v649_v54, 8.507059e+37 }
 0x2bc   : > { %v920_v50 = vpop.eup %919 }
 0x2bd   : > { %v641_v20 = vmul.f32 %v920_v50, %v639_v49  ;;  %vm646_vm2 = vweird.f32 %v920_v50 }
 0x2be   : > { %vm647_vm4 = vmor %vm645_vm3, %vm646_vm2 }
 0x2bf   : > { %v642_v51 = vsub.f32 1.0, %v641_v20 }
 0x2c1   : > { %v643_v53 = vmul.f32 %v920_v50, %v642_v51 }
 0x2c3   : > { %v644_v58 = vadd.f32 %v920_v50, %v643_v53 }
 0x2c5   : > { %v648_v60 = vsel %vm647_vm4, %v920_v50, %v644_v58 }
 0x2c6   : > { %v653_v62 = vsel %vm650_vm5, %v652_v59, %v648_v60 }
 0x2c7   : > { %v656_v63 = vrot.slane %v653_v62, 1  ;;  %v657_v3 = vperm.slane %v653_v62, 0 }
 0x2c9   : > { %v658_v0 = vperm.slane %v656_v63, 0  ;;  %v661_v5 = vmul.f32 %v657_v3, %v1327_v11  ;;  %v662_v8 = vmul.f32 %v657_v3, %v1324_v10  ;;  %v663_v9 = vmul.f32 %v657_v3, %v1330_v6 }
 0x2ca   : > { %v664_v12 = vmul.f32 %v657_v3, %v1336_v22 }
 0x2cb   : > { %v665_v13 = vmul.f32 %v658_v0, %v1307_v56  ;;  %669 = vst [vmem:[%s275_s26] sm:$0xff] %v661_v5  ;;  %v666_v14 = vmul.f32 %v658_v0, %v1304_v55  ;;  %v667_v10 = vmul.f32 %v658_v0, %v1310_v57  ;;  %v668_v11 = vmul.f32 %v658_v0, %v1315_v61 }
 0x2cc   : > { %670 = vst [vmem:[%s275_s26 + $0x8] sm:$0xff] %v662_v8 }
 0x2cd   : > { %671 = vst [vmem:[%s275_s26 + $0x10] sm:$0xff] %v663_v9 }
 0x2ce   : > { %672 = vst [vmem:[%s275_s26 + $0x18] sm:$0xff] %v664_v12 }
 0x2cf   : > { %673 = vst [vmem:[%s275_s26 + $0x20] sm:$0xff] %v665_v13 }
 0x2d0   : > { %674 = vst [vmem:[%s275_s26 + $0x28] sm:$0xff] %v666_v14 }
 0x2d1   : > { %675 = vst [vmem:[%s275_s26 + $0x30] sm:$0xff] %v667_v10 }
 0x2d2   : > { %676 = vst [vmem:[%s275_s26 + $0x38] sm:$0xff] %v668_v11 }
 0x2d3   : > { %1023 = shalt.err (!%p1020_p8)
}
 0x2d4   : > { %s1082_s9 = smov 128   ;;  %s1083_s15 = smov 8  }
 0x2d5   : > { %838 = dma.vmem_to_hbm [thread:$0]  (%p1169_p11), %s692_s4, 1024, %s694_s19, %s678_s10, %s1082_s9, %s1082_s9, %s1083_s15  }
 0x2d6 PF: > { %s708_s29 = sand.u32 1, %s1058_s20   ;;  %p1457_p9 = scmp.ge.s32.totalorder %s1070_s23, 2 }
 0x2d7   : > { %s709_s11 = scalar_lea.sflag [#allocation5], %s708_s29 }
 0x2d8   : > { %p852_p10 = pnand %p1457_p9, %p1173_p12 }
 0x2da   : > { %p853_p1 = pneg %p852_p10 }
 0x2dc   : > { %1053 = dma.done.wait (%p853_p1), %s709_s11, 1024  }
 0x2dd   : > { %1055 = vsyncadd (%p853_p1), %s709_s11, 4294966272  ;;  %p21_p2 = scmp.ge.s32.totalorder %s1142_s25, 4   ;;  %s1458_s20 = smov %s1062_s21 }
 0x2de   : > { %s1459_s21 = smov %s1066_s22  ;;  %s1460_s22 = smov %s1154_s28 }
 0x2df   : > { %s1461_s23 = smov %s1142_s25  ;;  %23 = sbr.rel (!%p21_p2) target bundleno = 10 (0xa), region = 94 }
 0x2e4   :  { %715 = vsyncpa [#allocation4], 1 }
 0x2e5   :  { %717 = vsyncpa [#allocation4 + $0x1], 1 }
 0x2e6   :  { %718 = vsyncpa [#allocation8], 1 }
 0x2e7   :  { %719 = vsyncpa [#allocation5], 1 }
 0x2e8   :  { %721 = vsyncpa [#allocation5 + $0x1], 1 }
 0x2e9   :  { %722 = vsyncpa [#allocation6], 1 }
 0x2ea   :  { %724 = vsyncpa [#allocation6 + $0x1], 1 }

</bundles_post_ra>
